<compile_context>
chip_gen: v7x
topology: tpu7x:2x2x1
jax: 0.10.0
libtpu: 0.0.40
codegen_flags: <defaults>
</compile_context>

<pallas_src>
import functools

import jax
import jax.numpy as jnp
from jax.experimental import pallas as pl
from jax.experimental.pallas import tpu as pltpu

_LANE = 128
_SUBLANE = 8


# ---------------------------------------------------------------------------
# Kernels
# ---------------------------------------------------------------------------
def _pool_kernel(x_ref, o_ref, acc_ref, *, inv_hw):
    """Global spatial mean over packed rows (rows = flattened (b, c) pairs).

    x_ref   : (rt, hw_tile)   current H*W tile of the packed (B*C, HW_pad) input
    o_ref   : (1, rt, 1)      per-row partial mean (resident across reduction axis)
    acc_ref : (rt, 1) f32     running spatial-sum accumulator (VMEM scratch)
    """
    k = pl.program_id(2)

    @pl.when(k == 0)
    def _init():
        acc_ref[...] = jnp.zeros_like(acc_ref)

    # Per-tile cast -> f32 accumulation (bf16 inputs halve HBM traffic; v5e VPU
    # has no bf16, so the explicit cast is required there).
    x = x_ref[...].astype(jnp.float32)
    acc_ref[...] += jnp.sum(x, axis=-1, keepdims=True)
    # TODO(synk): the per-step cross-lane reduce still touches the XLU; deferring
    # the final 128-lane fold to the k==last step is a further (small) VALU-only win.

    @pl.when(k == pl.num_programs(2) - 1)
    def _finalize():
        o_ref[0] = acc_ref[...] * inv_hw


def _linear_kernel(p_ref, w_ref, b_ref, o_ref):
    """Head Linear on the pooled features: (B8, Cp) @ (Cp, OUT_pad) + bias."""
    o_ref[...] = (
        jnp.dot(p_ref[...], w_ref[...], preferred_element_type=jnp.float32)
        + b_ref[...]
    )


# ---------------------------------------------------------------------------
# One-time parameter prep (hoisted out of the per-call path)
# ---------------------------------------------------------------------------
def prepare_head_params(weight, bias):
    """Transpose the PyTorch nn.Linear weight (OUT, C) -> (C, OUT), pad OUT up to
    a lane-dense multiple of 128 and C up to a sublane multiple of 8 (zero rows
    contribute nothing), so the head kernel's loads/stores are unmasked."""
    out_features, c = weight.shape
    out_pad = max(_LANE, -(-out_features // _LANE) * _LANE)
    c_pad = max(_SUBLANE, -(-c // _SUBLANE) * _SUBLANE)
    w_t = jnp.zeros((c_pad, out_pad), dtype=jnp.float32).at[:c, :out_features].set(
        weight.T.astype(jnp.float32))
    b_p = jnp.zeros((1, out_pad), dtype=jnp.float32).at[:, :out_features].set(
        bias.astype(jnp.float32))
    return w_t, b_p, out_features


# ---------------------------------------------------------------------------
# Tiling heuristics
# ---------------------------------------------------------------------------
def _vmem_budget():
    """Return (input-window budget bytes, vmem_limit_bytes) per TPU generation.

    v7x has only 64 MiB physical VMEM per TensorCore -> 40 MiB scoped limit and
    ~9 MiB blocks; v5e/v6e have 128 MiB physical -> 64 MiB limit and ~15 MiB blocks.
    """
    try:
        cap = int(getattr(pltpu.get_tpu_info(), "vmem_capacity_bytes", 64 * 2**20))
    except Exception:  # CPU emulator / older runtimes: fall back to the safe path.
        cap = 64 * 2**20
    limit = 64 * 2**20 if cap >= 100 * 2**20 else 40 * 2**20
    return limit - 4 * 2**20, limit


def _pick_row_tile(n_rows):
    """Rows per block for the pooling pass: a multiple of 8 so sublanes are fully
    packed; prefers an exact divisor of n_rows and >= 2 row tiles (v7x megacore)."""
    if n_rows <= _SUBLANE:
        return n_rows                       # single block; block dim == full dim
    cap = min(n_rows // 2, 256)             # keep >= 2 row tiles when possible
    cap -= cap % _SUBLANE
    best = _SUBLANE
    t = _SUBLANE
    while t <= cap:
        if n_rows % t == 0:
            best = t
        t += _SUBLANE
    return best


def _pick_hw_tile(hw, rows_block, itemsize, window_bytes, n_buffers):
    """Lane tile for the H*W reduction axis.

    Budgets by the *padded* VMEM footprint: rows rounded up to the dtype's sublane
    multiple, `n_buffers` pipelined copies, plus a conservative one-block f32
    temporary for the in-kernel cast."""
    sub_in = _SUBLANE * max(1, 4 // itemsize)            # 8 f32 / 16 bf16 / 32 int8
    rows_in = -(-rows_block // sub_in) * sub_in
    rows_f32 = -(-rows_block // _SUBLANE) * _SUBLANE
    denom = n_buffers * rows_in * itemsize + rows_f32 * 4
    max_lanes = max(_LANE, (window_bytes // denom) // _LANE * _LANE)

    hw_up = -(-hw // _LANE) * _LANE
    if hw_up <= max_lanes:
        return hw_up                         # whole (lane-padded) H*W in one block
    t = max_lanes
    while t >= _LANE:                        # largest 128-multiple exact divisor
        if hw % t == 0:
            return t
        t -= _LANE
    return max_lanes                         # fallback: pad H*W up to a tile multiple


# ---------------------------------------------------------------------------
# Forward pass
# ---------------------------------------------------------------------------
def network_forward(x_nchw, w_padded, b_padded, out_features):
    """Network forward: stem(Identity) -> backbone(Identity) -> head.

    x_nchw    : (B, C, H, W)   float32 or bfloat16
    w_padded  : (C_pad, OUT_pad) from prepare_head_params
    b_padded  : (1, OUT_pad)     from prepare_head_params
    returns   : (B, out_features) float32
    """
    B, C, H, W = x_nchw.shape
    R, HW = B * C, H * W
    c_pad, out_pad = w_padded.shape
    assert c_pad >= C

    # stem = Identity, backbone = Identity (glue).  Packed 2-D view: row = (b, c).
    x2 = x_nchw.reshape(R, HW)
    itemsize = x2.dtype.itemsize

    window_bytes, vmem_limit = _vmem_budget()
    rt = _pick_row_tile(R)
    hw_tile = _pick_hw_tile(HW, rt, itemsize, window_bytes, n_buffers=3)
    hw_pad = -(-HW // hw_tile) * hw_tile
    if hw_pad != HW:
        # Zeros don't change the sum; the mean divides by the true H*W.
        # TODO(synk): for very large ragged H*W this materializes a padded copy;
        # an in-kernel masked tail would avoid the extra HBM pass.
        x2 = jnp.pad(x2, ((0, 0), (0, hw_pad - HW)))

    n_rt = pl.cdiv(R, rt)        # last row block may be partial; those rows are
    n_hw = hw_pad // hw_tile     # independent and get sliced off below.
    # 2-way spatial split so both v7x TensorCores are busy when the batch is tiny.
    n_split = 2 if (n_rt == 1 and n_hw >= 2 and n_hw % 2 == 0) else 1
    n_hw_eff = n_hw // n_split
    r_out = n_rt * rt

    def x_index_map(s, i, k):
        return (i, s * n_hw_eff + k)

    x_pipeline = pl.Buffered(3) if n_hw_eff >= 3 else None

    kernel = functools.partial(_pool_kernel, inv_hw=1.0 / float(HW))
    cost = pl.CostEstimate(
        flops=R * HW,
        transcendentals=0,
        bytes_accessed=R * hw_pad * itemsize + n_split * r_out * 4,
    )

    partial_means = pl.pallas_call(
        kernel,
        out_shape=jax.ShapeDtypeStruct((n_split, r_out, 1), jnp.float32),
        grid_spec=pltpu.PrefetchScalarGridSpec(
            num_scalar_prefetch=0,
            grid=(n_split, n_rt, n_hw_eff),
            in_specs=[pl.BlockSpec((rt, hw_tile), x_index_map,
                                   pipeline_mode=x_pipeline)],
            out_specs=pl.BlockSpec((1, rt, 1), lambda s, i, k: (s, i, 0)),
            scratch_shapes=[pltpu.VMEM((rt, 1), jnp.float32)],
        ),
        compiler_params=pltpu.CompilerParams(
            dimension_semantics=("parallel", "parallel", "arbitrary"),
            vmem_limit_bytes=vmem_limit),
        cost_estimate=cost,
    )(x2)

    # Tiny glue, O(B*C): combine split partials, drop padded rows, reform (B, C).
    pooled = jnp.sum(partial_means, axis=0)[:R, 0].reshape(B, C)

    # Lane/sublane-padded operands so the head kernel's loads/stores are unmasked.
    b8 = -(-B // _SUBLANE) * _SUBLANE
    pooled_pad = jnp.zeros((b8, c_pad), jnp.float32).at[:B, :C].set(pooled)

    cost_lin = pl.CostEstimate(
        flops=2 * B * C * out_features,
        transcendentals=0,
        bytes_accessed=4 * (b8 * c_pad + c_pad * out_pad + out_pad + b8 * out_pad),
    )

    # TODO(synk): for extremely large B, tile the batch axis of this head matmul.
    out_padded = pl.pallas_call(
        _linear_kernel,
        out_shape=jax.ShapeDtypeStruct((b8, out_pad), jnp.float32),
        grid_spec=pltpu.PrefetchScalarGridSpec(
            num_scalar_prefetch=0,
            grid=(1,),
            in_specs=[pl.BlockSpec((b8, c_pad), lambda i: (0, 0)),
                      pl.BlockSpec((c_pad, out_pad), lambda i: (0, 0)),
                      pl.BlockSpec((1, out_pad), lambda i: (0, 0))],
            out_specs=pl.BlockSpec((b8, out_pad), lambda i: (0, 0)),
        ),
        compiler_params=pltpu.CompilerParams(
            dimension_semantics=("arbitrary",)),
        cost_estimate=cost_lin,
    )(pooled_pad, w_padded, b_padded)

    return out_padded[:B, :out_features]


if __name__ == "__main__":
    # Small shapes consistent with the module's 4-D branch.
    B, C, H, W = 2, 4, 16, 16
    OUT = 10

    key = jax.random.PRNGKey(0)
    kx, kw, kb = jax.random.split(key, 3)

    x = jax.random.normal(kx, (B, C, H, W), dtype=jnp.float32)
    # Deterministic synthetic nn.Linear(C, OUT) parameters (PyTorch layout).
    bound = 1.0 / (C ** 0.5)
    weight = jax.random.uniform(kw, (OUT, C), minval=-bound, maxval=bound,
                                dtype=jnp.float32)
    bias = jax.random.uniform(kb, (OUT,), minval=-bound, maxval=bound,
                              dtype=jnp.float32)

    # One-time parameter prep (transpose + lane/sublane padding).
    w_pad, b_pad, out_features = prepare_head_params(weight, bias)

    out = network_forward(x, w_pad, b_pad, out_features)
    out = jax.block_until_ready(out)

    # Pure-JAX reference check of the same semantics.
    ref = jnp.mean(x, axis=(2, 3)) @ weight.T + bias
    assert out.shape == (B, OUT)
    assert jnp.allclose(out, ref, atol=1e-5, rtol=1e-5)

    # TODO(synk): forward_window (sliding-window ensemble) not implemented — it is
    # an inference-time outer loop over forward(), not part of the core kernel.
    print("KERNEL_OK")
</pallas_src>

<mosaic_0001>
module attributes {stable_mosaic.version = 11 : i64} {
  func.func @_pool_kernel(%arg0: i32, %arg1: i32, %arg2: i32, %arg3: memref<8x256xf32, #tpu.memory_space<vmem>>, %arg4: memref<1x8x1xf32, #tpu.memory_space<vmem>>, %arg5: memref<8x1xf32, #tpu.memory_space<vmem>>) attributes {dimension_semantics = [#tpu.dimension_semantics<parallel>, #tpu.dimension_semantics<parallel>, #tpu.dimension_semantics<arbitrary>], iteration_bounds = array<i64: 1, 1, 1>, scalar_prefetch = 0 : i64, scratch_operands = 1 : i64, tpu.core_type = #tpu.core_type<tc>, window_params = [{transform_indices = @transform_0, window_bounds = array<i64: 8, 256>}, {transform_indices = @transform_1, window_bounds = array<i64: 1, 8, 1>}]} {
    %c0_i32 = arith.constant 0 : i32
    %0 = arith.cmpi eq, %arg2, %c0_i32 : i32
    %1 = arith.extui %0 : i1 to i32
    %c0_i32_0 = arith.constant 0 : i32
    %2 = arith.cmpi ne, %1, %c0_i32_0 : i32
    scf.if %2 {
      %cst_8 = arith.constant 0.000000e+00 : f32
      %12 = vector.broadcast %cst_8 : f32 to vector<8x1xf32>
      %c0_9 = arith.constant 0 : index
      %c0_10 = arith.constant 0 : index
      %13 = vector.load %arg5[%c0_9, %c0_10] : memref<8x1xf32, #tpu.memory_space<vmem>>, vector<8x1xf32>
      tpu.vector_store %arg5[%c0_9, %c0_10], %12 {strides = array<i32>} : memref<8x1xf32, #tpu.memory_space<vmem>>, vector<8x1xf32>,
    } else {
    }
    %c0 = arith.constant 0 : index
    %c0_1 = arith.constant 0 : index
    %3 = vector.load %arg3[%c0, %c0_1] : memref<8x256xf32, #tpu.memory_space<vmem>>, vector<8x256xf32>
    %c0_2 = arith.constant 0 : index
    %c0_3 = arith.constant 0 : index
    %4 = vector.load %arg5[%c0_2, %c0_3] : memref<8x1xf32, #tpu.memory_space<vmem>>, vector<8x1xf32>
    %cst = arith.constant dense<0.000000e+00> : vector<8xf32>
    %5 = vector.multi_reduction <add>, %3, %cst [1] : vector<8x256xf32> to vector<8xf32>
    %6 = vector.shape_cast %5 : vector<8xf32> to vector<8x1xf32>
    %7 = arith.addf %4, %6 : vector<8x1xf32>
    %c0_4 = arith.constant 0 : index
    %c0_5 = arith.constant 0 : index
    %8 = vector.load %arg5[%c0_4, %c0_5] : memref<8x1xf32, #tpu.memory_space<vmem>>, vector<8x1xf32>
    tpu.vector_store %arg5[%c0_4, %c0_5], %7 {strides = array<i32>} : memref<8x1xf32, #tpu.memory_space<vmem>>, vector<8x1xf32>,
    %c0_i32_6 = arith.constant 0 : i32
    %9 = arith.cmpi eq, %arg2, %c0_i32_6 : i32
    %10 = arith.extui %9 : i1 to i32
    %c0_i32_7 = arith.constant 0 : i32
    %11 = arith.cmpi ne, %10, %c0_i32_7 : i32
    scf.if %11 {
      %c0_8 = arith.constant 0 : index
      %c0_9 = arith.constant 0 : index
      %12 = vector.load %arg5[%c0_8, %c0_9] : memref<8x1xf32, #tpu.memory_space<vmem>>, vector<8x1xf32>
      %cst_10 = arith.constant 3.906250e-03 : f32
      %13 = vector.broadcast %cst_10 : f32 to vector<8x1xf32>
      %14 = arith.mulf %12, %13 : vector<8x1xf32>
      %c0_11 = arith.constant 0 : index
      %c0_12 = arith.constant 0 : index
      %c0_13 = arith.constant 0 : index
      %15 = vector.load %arg4[%c0_11, %c0_12, %c0_13] : memref<1x8x1xf32, #tpu.memory_space<vmem>>, vector<1x8x1xf32>
      %16 = vector.shape_cast %15 : vector<1x8x1xf32> to vector<8x1xf32>
      %17 = vector.shape_cast %14 : vector<8x1xf32> to vector<1x8x1xf32>
      tpu.vector_store %arg4[%c0_11, %c0_12, %c0_13], %17 {strides = array<i32>} : memref<1x8x1xf32, #tpu.memory_space<vmem>>, vector<1x8x1xf32>,
    } else {
    }
    return
  }
  func.func @transform_0(%arg0: i32, %arg1: i32, %arg2: i32) -> (i32, i32) {
    %c1_i32 = arith.constant 1 : i32
    %0 = arith.muli %arg0, %c1_i32 : i32
    %1 = arith.addi %0, %arg2 : i32
    %c0_i32 = arith.constant 0 : i32
    return %arg1, %1 : i32, i32
  }
  func.func @transform_1(%arg0: i32, %arg1: i32, %arg2: i32) -> (i32, i32, i32) {
    %c0_i32 = arith.constant 0 : i32
    %c0_i32_0 = arith.constant 0 : i32
    return %arg0, %arg1, %c0_i32 : i32, i32, i32
  }
}

</mosaic_0001>

<bundles_post_ra>
// kernel: tpu_custom_call.1
= control target key start
LH: loop header
LB: loop body
LE: loop exit
PB: predicated region body
PF: predicated region fallthrough
CT: control target
= control target key end

     0   :  { %6 = vsyncpa [#allocation4], 0  ;;  %s78_s6 = smov [#allocation3]   ;;  %s105_s0 = inlined_call_operand.hbm [shape: f32[8,256], index: 0, kind: input, shape index: {}]   ;;  %s106_s1 = inlined_call_operand.vmem [shape: f32[1,8,1], index: 1, kind: output, shape index: {}]  }
   0x1   :  { %s17_s7 = sshll.u32 %s78_s6, 4  ;;  %s54_s10 = scalar_lea.hbm %s105_s0, 256  ;;  %s18_s7 = int_to_ptr.vmem [resolvable:$true] %s17_s7 }
   0x2   :  { %p55_p0 = scmp.ne.s32.totalorder %s105_s0, %s54_s10  ;;  %p58_p1 = scmp.lt.u32.totalorder %s54_s10, %s105_s0 }
   0x4   :  { %p60_p2 = pnand %p58_p1, %p55_p0 }
   0x6   :  { %63 = shalt.err (!%p60_p2)
}
   0x7   :  { %s64_s15 = scalar_lea.vmem %s18_s7, 256  ;;  %p69_p4 = scmp.lt.s32.totalorder %s18_s7, %s18_s7 }
   0x8   :  { %p65_p3 = scmp.ne.s32.totalorder %s18_s7, %s64_s15  ;;  %p70_p5 = scmp.lt.s32.totalorder %s64_s15, %s64_s15 }
   0xa   :  { %p71_p6 = por %p70_p5, %p69_p4 }
   0xc   :  { %p72_p7 = pnand %p71_p6, %p65_p3 }
   0xe   :  { %75 = shalt.err (!%p72_p7)
}
   0xf   :  { %20 = dma.hbm_to_vmem [thread:$0]  %s105_s0, 256, %s18_s7, [#allocation4]  }
  0x10   :  { %76 = dma.done.wait [#allocation4], 256  }
  0x11   :  { %77 = vsyncadd [#allocation4], 4294967040  ;;  %vm30_vm0 = vcmask 7168   ;;  %v79_v0 = vmov 0.0   ;;  %v32_v1 = vld [vmem:[#allocation3] sm:$0xff]  ;;  %v33_v2 = vld [vmem:[#allocation3 + $0x8] sm:$0xff] }
  0x12   :  { %31 = vst.msk [vmem:[#allocation2] sm:$0xff] %vm30_vm0, %v79_v0  ;;  %v35_v3 = vadd.f32 %v33_v2, %v32_v1 }
  0x14   :  { %36 = vadd.xlane.f32.xlu0 %v35_v3 }
  0x19   :  { %v34_v4 = vld [vmem:[#allocation2] sm:$0xff] }
  0xa1   :  { %v37_v5 = vpop.xlane.xlu0 %36 }
  0xa2   :  { %v38_v6 = vadd.f32 %v37_v5, %v34_v4 }
  0xa4   :  { %40 = vst.msk [vmem:[#allocation2] sm:$0xff] %vm30_vm0, %v38_v6 }
  0xab   :  { %v44_v7 = vld [vmem:[#allocation2] sm:$0xff] }
  0xac   :  { %v45_v8 = vmul.f32 0.00390625, %v44_v7 }
  0xae   :  { %46 = vst.msk [vmem:[%s106_s1] sm:$0xff] %vm30_vm0, %v45_v8 }
  0xaf   :  { %51 = vsyncpa [#allocation4], 1 }

</bundles_post_ra>
